<compile_context>
chip_gen: v6e
topology: v6e:2x2x1
jax: 0.10.0
libtpu: 0.0.40
codegen_flags: <defaults>
</compile_context>

<pallas_src>
import functools

import jax
import jax.numpy as jnp
from jax.experimental import pallas as pl
from jax.experimental.pallas import tpu as pltpu

# ~1M elements (4 MiB f32) per input block.
_BLOCK_ELEMS = 1 << 20
# 'none' path keeps 3 arrays x 2 pipeline buffers resident (~24 MiB with 4 MiB
# blocks): above v5e's 16 MiB scoped default, below v7x's 64 MiB physical.
_VMEM_LIMIT_BYTES = 48 << 20
# Lane-dense last dims to try (multiples of 128, widest first).
_LANE_WIDTHS = (1024, 512, 256, 128)


def _int_pow(x, gamma: float):
    """x ** gamma, using VALU multiplies when gamma is a small integer."""
    g = float(gamma)
    if g == int(g) and 0 <= int(g) <= 6:
        gi = int(g)
        if gi == 0:
            return jnp.ones_like(x)
        r = x
        for _ in range(gi - 1):
            r = r * x
        return r
    return jnp.power(x, g)


def _focal_loss_block(x, t, *, alpha, gamma, eps):
    x = x.astype(jnp.float32)
    t = t.astype(jnp.float32)
    # sigmoid(x) == 0.5 * (tanh(x/2) + 1): one EUP op instead of exp + recip.
    p = 0.5 * (jnp.tanh(0.5 * x) + 1.0)
    pos = _int_pow(1.0 - p, gamma) * jnp.log(p + eps)
    neg = _int_pow(p, gamma) * jnp.log(1.0 - p + eps)
    return -alpha * t * pos - (1.0 - alpha) * (1.0 - t) * neg


def _focal_none_kernel(x_ref, t_ref, o_ref, *, alpha, gamma, eps):
    loss = _focal_loss_block(x_ref[...], t_ref[...],
                             alpha=alpha, gamma=gamma, eps=eps)
    o_ref[...] = loss.astype(o_ref.dtype)


def _focal_sum_kernel(x_ref, t_ref, o_ref, *, alpha, gamma, eps,
                      rows, block_rows, blocks_per_core):
    # o_ref is a (1, L) f32 accumulator resident across the inner
    # ("arbitrary") grid axis; one accumulator row per outer ("parallel")
    # core index.
    c = pl.program_id(0)
    j = pl.program_id(1)

    @pl.when(j == 0)
    def _():
        o_ref[...] = jnp.zeros_like(o_ref)

    loss = _focal_loss_block(x_ref[...], t_ref[...],
                             alpha=alpha, gamma=gamma, eps=eps)

    # Rows of the array actually covered by this block.  Block-relative row
    # indices: no int32 element-index overflow even for multi-billion-element
    # inputs, and the mask is only materialized for the (rare) partial /
    # overflow blocks.
    valid_rows = rows - (c * blocks_per_core + j) * block_rows

    @pl.when(valid_rows >= block_rows)
    def _():
        o_ref[...] += jnp.sum(loss, axis=0, keepdims=True)

    @pl.when(valid_rows < block_rows)
    def _():
        rid = jax.lax.broadcasted_iota(jnp.int32, loss.shape, 0)
        masked = jnp.where(rid < valid_rows, loss, 0.0)
        o_ref[...] += jnp.sum(masked, axis=0, keepdims=True)


class BinaryFocalLossWithLogits:
    """JAX/Pallas port of the PyTorch BinaryFocalLossWithLogits module."""

    def __init__(self, alpha: float, gamma: float = 2.0,
                 reduction: str = "none") -> None:
        self.alpha = float(alpha)
        self.gamma = float(gamma)
        self.reduction = reduction
        self.eps = 1e-06  # the module hard-codes 1e-6 (not the fn default 1e-8)

    # ------------------------------------------------------------------ API
    def __call__(self, inp: jnp.ndarray, target: jnp.ndarray) -> jnp.ndarray:
        if inp.ndim < 2:
            raise ValueError(f"Invalid input shape, expect BxCx*. Got {inp.shape}")
        if inp.shape[0] != target.shape[0]:
            raise ValueError("batch sizes of input and target must match")
        if self.reduction not in ("none", "mean", "sum"):
            raise NotImplementedError(f"Invalid reduction mode: {self.reduction}")

        total = int(inp.size)

        # Ragged totals can't be viewed lane-dense without materializing a
        # padded copy of both inputs (~2-3x HBM traffic).  XLA's fused
        # elementwise path is already at the HBM roofline for this
        # memory-bound loss, so use it for the uncommon ragged case.
        if total == 0 or total % 128 != 0:
            return self._jnp_fallback(inp, target)

        lane = next(l for l in _LANE_WIDTHS if total % l == 0)
        rows = total // lane
        x2 = inp.reshape(rows, lane)      # free bitcast: no pad, no copy
        t2 = target.reshape(rows, lane)

        max_rows = _BLOCK_ELEMS // lane   # multiple of 8 for every lane width
        if rows <= max_rows:
            block_rows, num_blocks = rows, 1
        else:
            block_rows, num_blocks = max_rows, -(-rows // max_rows)

        if self.reduction == "none":
            return self._run_none(x2, t2, rows, lane, block_rows, num_blocks,
                                  inp.shape, inp.dtype)
        return self._run_reduce(x2, t2, rows, lane, block_rows, num_blocks,
                                total, inp.dtype)

    # --------------------------------------------------------- Pallas paths
    def _run_none(self, x2, t2, rows, lane, block_rows, num_blocks,
                  orig_shape, out_dtype):
        kernel = functools.partial(_focal_none_kernel, alpha=self.alpha,
                                   gamma=self.gamma, eps=self.eps)
        loss2 = pl.pallas_call(
            kernel,
            out_shape=jax.ShapeDtypeStruct((rows, lane), out_dtype),
            grid_spec=pltpu.PrefetchScalarGridSpec(
                num_scalar_prefetch=0,
                grid=(num_blocks,),
                in_specs=[pl.BlockSpec((block_rows, lane), lambda i: (i, 0)),
                          pl.BlockSpec((block_rows, lane), lambda i: (i, 0))],
                out_specs=pl.BlockSpec((block_rows, lane), lambda i: (i, 0)),
            ),
            compiler_params=pltpu.CompilerParams(
                dimension_semantics=("parallel",),
                vmem_limit_bytes=_VMEM_LIMIT_BYTES),
        )(x2, t2)
        return loss2.reshape(orig_shape)

    def _run_reduce(self, x2, t2, rows, lane, block_rows, num_blocks,
                    total, out_dtype):
        # Leading "parallel" axis of size 2 shards the reduction across v7x's
        # two TensorCores; it degenerates to a cheap sequential loop on
        # single-TC chips (v5e/v6e).
        split = 2 if num_blocks >= 2 else 1
        blocks_per_core = -(-num_blocks // split)

        def in_map(c, j):
            idx = c * blocks_per_core + j
            # Clamp overflow blocks (from the 2-way split's cdiv) to a valid
            # block; their contribution is masked to zero inside the kernel.
            return (jnp.minimum(idx, num_blocks - 1), 0)

        kernel = functools.partial(
            _focal_sum_kernel, alpha=self.alpha, gamma=self.gamma,
            eps=self.eps, rows=rows, block_rows=block_rows,
            blocks_per_core=blocks_per_core)

        partial_lanes = pl.pallas_call(
            kernel,
            out_shape=jax.ShapeDtypeStruct((split, lane), jnp.float32),
            grid_spec=pltpu.PrefetchScalarGridSpec(
                num_scalar_prefetch=0,
                grid=(split, blocks_per_core),
                in_specs=[pl.BlockSpec((block_rows, lane), in_map),
                          pl.BlockSpec((block_rows, lane), in_map)],
                out_specs=pl.BlockSpec((1, lane), lambda c, j: (c, 0)),
            ),
            compiler_params=pltpu.CompilerParams(
                dimension_semantics=("parallel", "arbitrary"),
                vmem_limit_bytes=_VMEM_LIMIT_BYTES),
        )(x2, t2)

        s = jnp.sum(partial_lanes)
        if self.reduction == "mean":
            s = s / total
        return s.astype(out_dtype)

    # -------------------------------------------------- ragged / tiny path
    def _jnp_fallback(self, inp, target):
        loss = _focal_loss_block(inp, target, alpha=self.alpha,
                                 gamma=self.gamma, eps=self.eps)
        if self.reduction == "none":
            return loss.astype(inp.dtype)
        s = jnp.sum(loss)
        if self.reduction == "mean":
            s = s / inp.size
        return s.astype(inp.dtype)


def _reference(inp, target, alpha, gamma, eps):
    """Direct transcription of the PyTorch function (sigmoid-based)."""
    p = jax.nn.sigmoid(inp.astype(jnp.float32))
    t = target.astype(jnp.float32)
    return (-alpha * (1.0 - p) ** gamma * t * jnp.log(p + eps)
            - (1.0 - alpha) * p ** gamma * (1.0 - t) * jnp.log(1.0 - p + eps))


if __name__ == "__main__":
    key = jax.random.PRNGKey(0)
    k1, k2, k3, k4, k5, k6 = jax.random.split(key, 6)

    # --- small, module-shaped (N, 1, H, W) test: single-block Pallas path ---
    N, C, H, W = 2, 1, 16, 16
    logits = jax.random.normal(k1, (N, C, H, W), dtype=jnp.float32) * 2.0
    targets = (jax.random.uniform(k2, (N, C, H, W)) > 0.5).astype(jnp.float32)
    ref = _reference(logits, targets, 0.25, 2.0, 1e-06)

    out = BinaryFocalLossWithLogits(alpha=0.25, gamma=2.0,
                                    reduction="none")(logits, targets)
    out = jax.block_until_ready(out)
    assert out.shape == logits.shape, (out.shape, logits.shape)
    assert jnp.allclose(out, ref, atol=1e-4, rtol=1e-4), \
        float(jnp.max(jnp.abs(out - ref)))

    out_mean = BinaryFocalLossWithLogits(0.25, 2.0, "mean")(logits, targets)
    out_mean = jax.block_until_ready(out_mean)
    assert jnp.allclose(out_mean, jnp.mean(ref), atol=1e-4, rtol=1e-3)

    out_sum = BinaryFocalLossWithLogits(0.25, 2.0, "sum")(logits, targets)
    out_sum = jax.block_until_ready(out_sum)
    assert jnp.allclose(out_sum, jnp.sum(ref), atol=1e-3, rtol=1e-3)

    # --- multi-block test: partial last block + 2-way core split + clamp ---
    big_shape = (2, 1, 4297, 256)   # total = 2,200,064 (mult of 512, not 1024)
    lg_b = jax.random.normal(k3, big_shape, dtype=jnp.float32)
    tg_b = (jax.random.uniform(k4, big_shape) > 0.5).astype(jnp.float32)
    ref_b = _reference(lg_b, tg_b, 0.25, 2.0, 1e-06)

    out_b = BinaryFocalLossWithLogits(0.25, 2.0, "none")(lg_b, tg_b)
    out_b = jax.block_until_ready(out_b)
    assert jnp.allclose(out_b, ref_b, atol=1e-4, rtol=1e-3), \
        float(jnp.max(jnp.abs(out_b - ref_b)))

    out_b_mean = BinaryFocalLossWithLogits(0.25, 2.0, "mean")(lg_b, tg_b)
    out_b_mean = jax.block_until_ready(out_b_mean)
    assert jnp.allclose(out_b_mean, jnp.mean(ref_b), atol=1e-4, rtol=2e-3)

    # --- ragged total (not a multiple of 128): fused-XLA fallback path ---
    lg2 = jax.random.normal(k5, (2, 1, 7, 9), dtype=jnp.float32) * 2.0
    tg2 = (jax.random.uniform(k6, (2, 1, 7, 9)) > 0.5).astype(jnp.float32)
    ref2 = _reference(lg2, tg2, 0.25, 2.0, 1e-06)
    out2 = BinaryFocalLossWithLogits(0.25, 2.0, "none")(lg2, tg2)
    out2 = jax.block_until_ready(out2)
    assert jnp.allclose(out2, ref2, atol=1e-4, rtol=1e-4)
    out2_sum = BinaryFocalLossWithLogits(0.25, 2.0, "sum")(lg2, tg2)
    out2_sum = jax.block_until_ready(out2_sum)
    assert jnp.allclose(out2_sum, jnp.sum(ref2), atol=1e-3, rtol=1e-3)

    print("KERNEL_OK")
</pallas_src>

<mosaic_0001>
module attributes {stable_mosaic.version = 11 : i64} {
  func.func @_focal_none_kernel(%arg0: i32, %arg1: memref<1x512xf32, #tpu.memory_space<vmem>>, %arg2: memref<1x512xf32, #tpu.memory_space<vmem>>, %arg3: memref<1x512xf32, #tpu.memory_space<vmem>>) attributes {dimension_semantics = [#tpu.dimension_semantics<parallel>], iteration_bounds = array<i64: 1>, scalar_prefetch = 0 : i64, scratch_operands = 0 : i64, tpu.core_type = #tpu.core_type<tc>, window_params = [{transform_indices = @transform_0, window_bounds = array<i64: 1, 512>}, {transform_indices = @transform_1, window_bounds = array<i64: 1, 512>}, {transform_indices = @transform_2, window_bounds = array<i64: 1, 512>}]} {
    %c0 = arith.constant 0 : index
    %c0_0 = arith.constant 0 : index
    %0 = vector.load %arg1[%c0, %c0_0] : memref<1x512xf32, #tpu.memory_space<vmem>>, vector<1x512xf32>
    %c0_1 = arith.constant 0 : index
    %c0_2 = arith.constant 0 : index
    %1 = vector.load %arg2[%c0_1, %c0_2] : memref<1x512xf32, #tpu.memory_space<vmem>>, vector<1x512xf32>
    %cst = arith.constant 5.000000e-01 : f32
    %2 = vector.broadcast %cst : f32 to vector<1x512xf32>
    %3 = arith.mulf %2, %0 : vector<1x512xf32>
    %4 = math.tanh %3 : vector<1x512xf32>
    %cst_3 = arith.constant 1.000000e+00 : f32
    %5 = vector.broadcast %cst_3 : f32 to vector<1x512xf32>
    %6 = arith.addf %4, %5 : vector<1x512xf32>
    %cst_4 = arith.constant 5.000000e-01 : f32
    %7 = vector.broadcast %cst_4 : f32 to vector<1x512xf32>
    %8 = arith.mulf %7, %6 : vector<1x512xf32>
    %cst_5 = arith.constant 1.000000e+00 : f32
    %9 = vector.broadcast %cst_5 : f32 to vector<1x512xf32>
    %10 = arith.subf %9, %8 : vector<1x512xf32>
    %11 = arith.mulf %10, %10 : vector<1x512xf32>
    %cst_6 = arith.constant 9.99999997E-7 : f32
    %12 = vector.broadcast %cst_6 : f32 to vector<1x512xf32>
    %13 = arith.addf %8, %12 : vector<1x512xf32>
    %14 = math.log %13 : vector<1x512xf32>
    %15 = arith.mulf %11, %14 : vector<1x512xf32>
    %16 = arith.mulf %8, %8 : vector<1x512xf32>
    %cst_7 = arith.constant 1.000000e+00 : f32
    %17 = vector.broadcast %cst_7 : f32 to vector<1x512xf32>
    %18 = arith.subf %17, %8 : vector<1x512xf32>
    %cst_8 = arith.constant 9.99999997E-7 : f32
    %19 = vector.broadcast %cst_8 : f32 to vector<1x512xf32>
    %20 = arith.addf %18, %19 : vector<1x512xf32>
    %21 = math.log %20 : vector<1x512xf32>
    %22 = arith.mulf %16, %21 : vector<1x512xf32>
    %cst_9 = arith.constant -2.500000e-01 : f32
    %23 = vector.broadcast %cst_9 : f32 to vector<1x512xf32>
    %24 = arith.mulf %23, %1 : vector<1x512xf32>
    %25 = arith.mulf %24, %15 : vector<1x512xf32>
    %cst_10 = arith.constant 1.000000e+00 : f32
    %26 = vector.broadcast %cst_10 : f32 to vector<1x512xf32>
    %27 = arith.subf %26, %1 : vector<1x512xf32>
    %cst_11 = arith.constant 7.500000e-01 : f32
    %28 = vector.broadcast %cst_11 : f32 to vector<1x512xf32>
    %29 = arith.mulf %28, %27 : vector<1x512xf32>
    %30 = arith.mulf %29, %22 : vector<1x512xf32>
    %31 = arith.subf %25, %30 : vector<1x512xf32>
    %c0_12 = arith.constant 0 : index
    %c0_13 = arith.constant 0 : index
    %32 = vector.load %arg3[%c0_12, %c0_13] : memref<1x512xf32, #tpu.memory_space<vmem>>, vector<1x512xf32>
    tpu.vector_store %arg3[%c0_12, %c0_13], %31 {strides = array<i32>} : memref<1x512xf32, #tpu.memory_space<vmem>>, vector<1x512xf32>,
    return
  }
  func.func @transform_0(%arg0: i32) -> (i32, i32) {
    %c0_i32 = arith.constant 0 : i32
    %c0_i32_0 = arith.constant 0 : i32
    return %arg0, %c0_i32 : i32, i32
  }
  func.func @transform_1(%arg0: i32) -> (i32, i32) {
    %c0_i32 = arith.constant 0 : i32
    %c0_i32_0 = arith.constant 0 : i32
    return %arg0, %c0_i32 : i32, i32
  }
  func.func @transform_2(%arg0: i32) -> (i32, i32) {
    %c0_i32 = arith.constant 0 : i32
    %c0_i32_0 = arith.constant 0 : i32
    return %arg0, %c0_i32 : i32, i32
  }
}

</mosaic_0001>

<bundles_post_ra>
// kernel: tpu_custom_call.1
= control target key start
LH: loop header
LB: loop body
LE: loop exit
PB: predicated region body
PF: predicated region fallthrough
CT: control target
= control target key end

     0   :  { %7 = vsyncpa [#allocation3], 0  ;;  %s182_s0 = inlined_call_operand.hbm [shape: f32[1,512], index: 0, kind: input, shape index: {}]   ;;  %s183_s1 = inlined_call_operand.hbm [shape: f32[1,512], index: 1, kind: input, shape index: {}]   ;;  %s184_s2 = inlined_call_operand.hbm [shape: f32[1,512], index: 2, kind: output, shape index: {}]  }
   0x1   :  { %8 = vsyncpa [#allocation6], 0 }
   0x2   :  { %9 = vsyncpa [#allocation4], 0  ;;  %s155_s9 = smov [#allocation2]   ;;  %s156_s11 = smov [#allocation5]  }
   0x3   :  { %s16_s10 = sshll.u32 %s155_s9, 4  ;;  %s26_s12 = sshll.u32 %s156_s11, 4  ;;  %s17_s10 = int_to_ptr.vmem [resolvable:$true] %s16_s10  ;;  %s27_s12 = int_to_ptr.vmem [resolvable:$true] %s26_s12 }
   0x4   :  { %s97_s13 = scalar_lea.vmem %s17_s10, 64  ;;  %p102_p1 = scmp.lt.s32.totalorder %s17_s10, %s17_s10 }
   0x5   :  { %p98_p0 = scmp.ne.s32.totalorder %s17_s10, %s97_s13  ;;  %p103_p2 = scmp.lt.s32.totalorder %s97_s13, %s97_s13 }
   0x7   :  { %p104_p3 = por %p103_p2, %p102_p1 }
   0x9   :  { %p105_p4 = pnand %p104_p3, %p98_p0 }
   0xb   :  { %108 = shalt.err (!%p105_p4)
}
   0xc   :  { %19 = dma.hbm_to_vmem [thread:$0]  %s182_s0, 64, %s17_s10, [#allocation3]  }
   0xd   :  { %s117_s16 = scalar_lea.vmem %s27_s12, 64  ;;  %p122_p6 = scmp.lt.s32.totalorder %s27_s12, %s27_s12 }
   0xe   :  { %p118_p5 = scmp.ne.s32.totalorder %s27_s12, %s117_s16  ;;  %p123_p7 = scmp.lt.s32.totalorder %s117_s16, %s117_s16 }
  0x10   :  { %p124_p8 = por %p123_p7, %p122_p6 }
  0x12   :  { %p125_p9 = pnand %p124_p8, %p118_p5 }
  0x14   :  { %128 = shalt.err (!%p125_p9)
}
  0x15   :  { %29 = dma.hbm_to_vmem [thread:$0]  %s183_s1, 64, %s27_s12, [#allocation6]  }
  0x16   :  { %149 = dma.done.wait [#allocation3], 64  }
  0x17   :  { %150 = vsyncadd [#allocation3], 4294967232 }
  0x18   :  { %151 = dma.done.wait [#allocation6], 64  }
  0x19   :  { %152 = vsyncadd [#allocation6], 4294967232  ;;  %v36_v0 = vld [vmem:[#allocation2] sm:$0xf]  ;;  %v37_v8 = vld [vmem:[#allocation5] sm:$0xf]  ;;  %v59_v19 = vlaneseq }
  0x1a   :  { %v38_v1 = vmul.f32 0.5, %v36_v0  ;;  %v55_v10 = vsub.f32 1.0, %v37_v8  ;;  %v53_v14 = vmul.f32 -0.25, %v37_v8  ;;  %s157_s0 = smov [#allocation7]  }
  0x1b   :  { %s70_s1 = sshll.u32 %s157_s0, 4  ;;  %vm61_vm0 = vcmp.lt.s32.totalorder %v59_v19, 512  ;;  %s71_s1 = int_to_ptr.vmem [resolvable:$true] %s70_s1 }
  0x1c   :  { %83 = vtanh.f32 %v38_v1  ;;  %v56_v18 = vmul.f32 0.75, %v55_v10  ;;  %s129_s19 = scalar_lea.vmem %s71_s1, 64  ;;  %p134_p11 = scmp.lt.s32.totalorder %s71_s1, %s71_s1 }
  0x1d   :  { %p130_p10 = scmp.ne.s32.totalorder %s71_s1, %s129_s19  ;;  %p135_p12 = scmp.lt.s32.totalorder %s129_s19, %s129_s19 }
  0x1f   :  { %p136_p13 = por %p135_p12, %p134_p11 }
  0x21   :  { %p137_p0 = pnand %p136_p13, %p130_p10 }
  0x29   :  { %v84_v2 = vpop.eup %83 }
  0x2a   :  { %v40_v3 = vadd.f32 1.0, %v84_v2 }
  0x2c   :  { %v41_v4 = vmul.f32 0.5, %v40_v3 }
  0x2e   :  { %v42_v5 = vsub.f32 1.0, %v41_v4  ;;  %v44_v6 = vadd.f32 1e-06, %v41_v4  ;;  %v48_v13 = vmul.f32 %v41_v4, %v41_v4 }
  0x30   :  { %85 = vlog2.f32 %v44_v6  ;;  %v49_v7 = vadd.f32 1e-06, %v42_v5  ;;  %v43_v9 = vmul.f32 %v42_v5, %v42_v5 }
  0x32   :  { %87 = vlog2.f32 %v49_v7 }
  0x3d   :  { %v86_v11 = vpop.eup %85 }
  0x3e   :  { %v46_v12 = vmul.f32 0.6931472, %v86_v11 }
  0x3f   :  { %v88_v15 = vpop.eup %87 }
  0x40   :  { %v47_v16 = vmul.f32 %v46_v12, %v43_v9  ;;  %v51_v17 = vmul.f32 0.6931472, %v88_v15 }
  0x42   :  { %v52_v20 = vmul.f32 %v51_v17, %v48_v13  ;;  %v54_v21 = vmul.f32 %v53_v14, %v47_v16 }
  0x44   :  { %v57_v22 = vmul.f32 %v56_v18, %v52_v20 }
  0x46   :  { %v58_v23 = vsub.f32 %v54_v21, %v57_v22 }
  0x48   :  { %63 = vst.msk [vmem:[#allocation7] sm:$0xf] %vm61_vm0, %v58_v23 }
  0x49   :  { %140 = shalt.err (!%p137_p0)
}
  0x4a   :  { %73 = dma.vmem_to_hbm [thread:$0]  %s71_s1, 64, %s184_s2, [#allocation4]  }
  0x4b   :  { %153 = dma.done.wait [#allocation4], 64  }
  0x4c   :  { %154 = vsyncadd [#allocation4], 4294967232 }
  0x4d   :  { %77 = vsyncpa [#allocation3], 1 }
  0x4e   :  { %78 = vsyncpa [#allocation6], 1 }
  0x4f   :  { %79 = vsyncpa [#allocation4], 1 }

</bundles_post_ra>
